<compile_context>
chip_gen: v6e
topology: v6e:2x2x1
jax: 0.10.0
libtpu: 0.0.40
codegen_flags: <defaults>
</compile_context>

<pallas_src>
import math
from functools import partial

import jax
import jax.numpy as jnp
from jax.experimental import pallas as pl
from jax.experimental.pallas import tpu as pltpu


# ---------------------------------------------------------------------------
# Pass 1: fused QKV projection, head-major outputs (B, H, N, hd).
# ---------------------------------------------------------------------------
def _qkv_proj_kernel(x_ref, wq_ref, wk_ref, wv_ref, bq_ref, bk_ref, bv_ref,
                     q_ref, k_ref, v_ref, *, num_heads):
    """Grid = (B, N // tn). Weights are head-major (H, C, hd), fully resident."""
    x_t = x_ref[0]                                              # (tn, C)
    for h in range(num_heads):                                  # static unroll
        q_h = jnp.dot(x_t, wq_ref[h], preferred_element_type=jnp.float32) + bq_ref[h]
        k_h = jnp.dot(x_t, wk_ref[h], preferred_element_type=jnp.float32) + bk_ref[h]
        v_h = jnp.dot(x_t, wv_ref[h], preferred_element_type=jnp.float32) + bv_ref[h]
        q_ref[0, h] = q_h.astype(q_ref.dtype)                   # (tn, hd)
        k_ref[0, h] = k_h.astype(k_ref.dtype)
        v_ref[0, h] = v_h.astype(v_ref.dtype)


# ---------------------------------------------------------------------------
# Pass 2: flash attention (all heads per step) + fused output projection.
# ---------------------------------------------------------------------------
def _flash_attn_proj_kernel(q_ref, k_ref, v_ref, wp_ref, bp_ref, o_ref,
                            m_scr, l_scr, acc_scr, y_scr,
                            *, num_heads, head_dim):
    """Grid = (B, n_q, n_k); online softmax over the kv axis (last, arbitrary)."""
    ki = pl.program_id(2)
    nk = pl.num_programs(2)
    compute_dtype = q_ref.dtype

    # ---- per (b, q-tile) init of the online-softmax state ----
    @pl.when(ki == 0)
    def _():
        m_scr[...] = jnp.full(m_scr.shape, -jnp.inf, m_scr.dtype)
        l_scr[...] = jnp.zeros(l_scr.shape, l_scr.dtype)
        acc_scr[...] = jnp.zeros(acc_scr.shape, acc_scr.dtype)

    q = q_ref[0]                                                # (H, tq, hd)
    k = k_ref[0]                                                # (H, tk, hd)
    v = v_ref[0]                                                # (H, tk, hd)

    # scores for all heads at once (batched over H), f32 accumulation
    s = jnp.einsum('hqd,hkd->hqk', q, k,
                   preferred_element_type=jnp.float32)          # (H, tq, tk)

    m_prev = m_scr[...]
    m_new = jnp.maximum(m_prev, jnp.max(s, axis=-1, keepdims=True))
    alpha = jnp.exp(m_prev - m_new)                             # (H, tq, 1)
    p = jnp.exp(s - m_new)                                      # (H, tq, tk) f32
    l_scr[...] = alpha * l_scr[...] + jnp.sum(p, axis=-1, keepdims=True)
    pv = jnp.einsum('hqk,hkd->hqd', p.astype(compute_dtype), v,
                    preferred_element_type=jnp.float32)         # (H, tq, hd)
    acc_scr[...] = alpha * acc_scr[...] + pv
    m_scr[...] = m_new

    # ---- finalize: normalize, assemble head-major (tq, C), single projection
    @pl.when(ki == nk - 1)
    def _():
        out_all = acc_scr[...] * pl.reciprocal(l_scr[...], approx=True)  # (H,tq,hd)
        for h in range(num_heads):                               # static unroll
            y_scr[:, h * head_dim:(h + 1) * head_dim] = out_all[h]
        y = y_scr[...].astype(compute_dtype)                     # (tq, C)
        o_ref[0] = (jnp.dot(y, wp_ref[...], preferred_element_type=jnp.float32)
                    + bp_ref[...]).astype(o_ref.dtype)


def _pick_tile(n, pref):
    """Largest tile <= pref that divides n and keeps blocks (8,128)-legal."""
    if n <= pref:
        return n
    for t in (pref, 512, 256, 128, 64, 32, 16, 8):
        if t <= pref and n % t == 0:
            return t
    return n  # single full-length tile (block dim == array dim is always legal)


def attention_forward(x, qkv_w, qkv_b, proj_w, proj_b, num_heads,
                      qk_scale=None, compute_dtype=jnp.bfloat16,
                      q_tile=512, kv_tile=512, proj_tile=512):
    """x: (B, N, C); qkv_w: (C, 3C); qkv_b: (3C,); proj_w: (C, C); proj_b: (C,)."""
    B, N, C = x.shape
    H = num_heads
    hd = C // H
    scale = float(qk_scale) if qk_scale is not None else hd ** (-0.5)
    out_dtype = x.dtype
    c_item = jnp.dtype(compute_dtype).itemsize

    tn = _pick_tile(N, proj_tile)
    tq = _pick_tile(N, q_tile)
    tk = _pick_tile(N, kv_tile)
    n_q = N // tq
    n_k = N // tk

    # Head-major, lane-aligned weight layouts; qk scale folded into Wq / bq.
    wq = (qkv_w[:, 0 * C:1 * C].reshape(C, H, hd).transpose(1, 0, 2) * scale)
    wk = qkv_w[:, 1 * C:2 * C].reshape(C, H, hd).transpose(1, 0, 2)      # (H, C, hd)
    wv = qkv_w[:, 2 * C:3 * C].reshape(C, H, hd).transpose(1, 0, 2)
    bq = (qkv_b[0 * C:1 * C] * scale).reshape(H, 1, hd).astype(jnp.float32)
    bk = qkv_b[1 * C:2 * C].reshape(H, 1, hd).astype(jnp.float32)
    bv = qkv_b[2 * C:3 * C].reshape(H, 1, hd).astype(jnp.float32)
    wp = proj_w.astype(compute_dtype)                                     # (C, C)
    bp = proj_b.reshape(1, C).astype(jnp.float32)

    xc = x.astype(compute_dtype)
    wq = wq.astype(compute_dtype)
    wk = wk.astype(compute_dtype)
    wv = wv.astype(compute_dtype)

    # ---------------- Pass 1: QKV projection (once per token) ----------------
    qkv_shape = jax.ShapeDtypeStruct((B, H, N, hd), compute_dtype)
    p1_flops = int(2 * B * N * C * 3 * C)
    p1_bytes = int(B * N * C * c_item + 3 * C * C * c_item + 3 * B * N * C * c_item)

    q_hm, k_hm, v_hm = pl.pallas_call(
        partial(_qkv_proj_kernel, num_heads=H),
        out_shape=(qkv_shape, qkv_shape, qkv_shape),
        grid_spec=pltpu.PrefetchScalarGridSpec(
            num_scalar_prefetch=0,
            grid=(B, N // tn),
            in_specs=[
                pl.BlockSpec((1, tn, C), lambda b, i: (b, i, 0)),   # x tile
                pl.BlockSpec((H, C, hd), lambda b, i: (0, 0, 0)),   # Wq (resident)
                pl.BlockSpec((H, C, hd), lambda b, i: (0, 0, 0)),   # Wk
                pl.BlockSpec((H, C, hd), lambda b, i: (0, 0, 0)),   # Wv
                pl.BlockSpec((H, 1, hd), lambda b, i: (0, 0, 0)),   # bq
                pl.BlockSpec((H, 1, hd), lambda b, i: (0, 0, 0)),   # bk
                pl.BlockSpec((H, 1, hd), lambda b, i: (0, 0, 0)),   # bv
            ],
            out_specs=[
                pl.BlockSpec((1, H, tn, hd), lambda b, i: (b, 0, i, 0)),
                pl.BlockSpec((1, H, tn, hd), lambda b, i: (b, 0, i, 0)),
                pl.BlockSpec((1, H, tn, hd), lambda b, i: (b, 0, i, 0)),
            ],
        ),
        compiler_params=pltpu.CompilerParams(
            dimension_semantics=("parallel", "parallel"),
            vmem_limit_bytes=48 * 1024 * 1024,
        ),
        cost_estimate=pl.CostEstimate(
            flops=p1_flops, transcendentals=0, bytes_accessed=p1_bytes),
    )(xc, wq, wk, wv, bq, bk, bv)

    # --------- Pass 2: flash attention + fused output projection -------------
    p2_flops = int(4 * B * H * N * N * hd + 2 * B * N * C * C)
    p2_trans = int(B * H * N * N)
    p2_bytes = int(B * N * C * c_item                     # Q read
                   + 2 * n_q * B * N * C * c_item          # K/V re-read per q tile
                   + C * C * c_item + C * 4                # proj weights / bias
                   + B * N * C * jnp.dtype(out_dtype).itemsize)   # output write

    out = pl.pallas_call(
        partial(_flash_attn_proj_kernel, num_heads=H, head_dim=hd),
        out_shape=jax.ShapeDtypeStruct((B, N, C), out_dtype),
        grid_spec=pltpu.PrefetchScalarGridSpec(
            num_scalar_prefetch=0,
            grid=(B, n_q, n_k),
            in_specs=[
                pl.BlockSpec((1, H, tq, hd), lambda b, qi, ki: (b, 0, qi, 0)),  # Q
                pl.BlockSpec((1, H, tk, hd), lambda b, qi, ki: (b, 0, ki, 0)),  # K
                pl.BlockSpec((1, H, tk, hd), lambda b, qi, ki: (b, 0, ki, 0)),  # V
                pl.BlockSpec((C, C), lambda b, qi, ki: (0, 0)),                 # proj_w
                pl.BlockSpec((1, C), lambda b, qi, ki: (0, 0)),                 # proj_b
            ],
            out_specs=pl.BlockSpec((1, tq, C), lambda b, qi, ki: (b, qi, 0)),
            scratch_shapes=[
                pltpu.VMEM((H, tq, 1), jnp.float32),    # m: running max
                pltpu.VMEM((H, tq, 1), jnp.float32),    # l: running denominator
                pltpu.VMEM((H, tq, hd), jnp.float32),   # acc: unnormalized PV
                pltpu.VMEM((tq, C), jnp.float32),       # head-major output assembly
            ],
        ),
        compiler_params=pltpu.CompilerParams(
            dimension_semantics=("parallel", "parallel", "arbitrary"),
            vmem_limit_bytes=48 * 1024 * 1024,
        ),
        cost_estimate=pl.CostEstimate(
            flops=p2_flops, transcendentals=p2_trans, bytes_accessed=p2_bytes),
    )(q_hm, k_hm, v_hm, wp, bp)
    return out


def attention_reference(x, qkv_w, qkv_b, proj_w, proj_b, num_heads, qk_scale=None):
    """Pure-JAX reference mirroring the PyTorch forward (eval mode, f32)."""
    B, N, C = x.shape
    hd = C // num_heads
    scale = qk_scale if qk_scale is not None else hd ** (-0.5)
    qkv = x @ qkv_w + qkv_b                                   # (B, N, 3C)
    qkv = qkv.reshape(B, N, 3, num_heads, hd).transpose(2, 0, 3, 1, 4)
    q, k, v = qkv[0], qkv[1], qkv[2]                          # (B, H, N, hd)
    q = q * scale
    attn = (q @ jnp.swapaxes(k, -2, -1)).astype(jnp.float32)
    attn = jax.nn.softmax(attn, axis=-1)
    out = (attn @ v.astype(jnp.float32)).transpose(0, 2, 1, 3).reshape(B, N, C)
    return out @ proj_w + proj_b


if __name__ == "__main__":
    key = jax.random.PRNGKey(0)
    B, N, C, H = 2, 16, 32, 4            # batch, tokens, dim, heads (hd = 8)
    input_size = int(math.sqrt(N))       # unused by forward; kept for parity

    k0, k1, k2, k3, k4 = jax.random.split(key, 5)
    x = jax.random.normal(k0, (B, N, C), dtype=jnp.float32)

    # Deterministic synthetic parameters (roughly Linear-default scale).
    qkv_w = jax.random.normal(k1, (C, 3 * C), dtype=jnp.float32) * (1.0 / math.sqrt(C))
    qkv_b = jax.random.normal(k2, (3 * C,), dtype=jnp.float32) * 0.01
    proj_w = jax.random.normal(k3, (C, C), dtype=jnp.float32) * (1.0 / math.sqrt(C))
    proj_b = jax.random.normal(k4, (C,), dtype=jnp.float32) * 0.01

    ref = attention_reference(x, qkv_w, qkv_b, proj_w, proj_b, num_heads=H)

    # f32 path with forced multi-tile grid: exercises the online softmax across
    # kv tiles, multiple q tiles and the pass-1 / pass-2 handoff.
    out_f32 = attention_forward(x, qkv_w, qkv_b, proj_w, proj_b, num_heads=H,
                                compute_dtype=jnp.float32,
                                q_tile=8, kv_tile=8, proj_tile=8)
    out_f32 = jax.block_until_ready(out_f32)
    assert out_f32.shape == (B, N, C)
    err_f32 = float(jnp.max(jnp.abs(out_f32 - ref)))
    assert jnp.allclose(out_f32, ref, atol=2e-2, rtol=2e-2), \
        f"f32-path mismatch vs reference (max abs err {err_f32})"

    # bf16 MXU operands (production config), default tiling.
    out_bf16 = attention_forward(x, qkv_w, qkv_b, proj_w, proj_b, num_heads=H,
                                 compute_dtype=jnp.bfloat16)
    out_bf16 = jax.block_until_ready(out_bf16)
    assert out_bf16.shape == (B, N, C)
    err_bf16 = float(jnp.max(jnp.abs(out_bf16 - ref)))
    assert jnp.allclose(out_bf16, ref, atol=1e-1, rtol=1e-1), \
        f"bf16-path mismatch vs reference (max abs err {err_bf16})"

    print("KERNEL_OK")
</pallas_src>

<mosaic_0001>
module attributes {stable_mosaic.version = 11 : i64} {
  func.func @_qkv_proj_kernel(%arg0: i32, %arg1: i32, %arg2: memref<1x8x32xf32, #tpu.memory_space<vmem>>, %arg3: memref<4x32x8xf32, #tpu.memory_space<vmem>>, %arg4: memref<4x32x8xf32, #tpu.memory_space<vmem>>, %arg5: memref<4x32x8xf32, #tpu.memory_space<vmem>>, %arg6: memref<4x1x8xf32, #tpu.memory_space<vmem>>, %arg7: memref<4x1x8xf32, #tpu.memory_space<vmem>>, %arg8: memref<4x1x8xf32, #tpu.memory_space<vmem>>, %arg9: memref<1x4x8x8xf32, #tpu.memory_space<vmem>>, %arg10: memref<1x4x8x8xf32, #tpu.memory_space<vmem>>, %arg11: memref<1x4x8x8xf32, #tpu.memory_space<vmem>>) attributes {dimension_semantics = [#tpu.dimension_semantics<parallel>, #tpu.dimension_semantics<parallel>], iteration_bounds = array<i64: 2, 2>, scalar_prefetch = 0 : i64, scratch_operands = 0 : i64, tpu.core_type = #tpu.core_type<tc>, window_params = [{transform_indices = @transform_0, window_bounds = array<i64: 1, 8, 32>}, {pipeline_mode = #tpu.pipeline_mode<synchronous>, transform_indices = @transform_1, window_bounds = array<i64: 4, 32, 8>}, {pipeline_mode = #tpu.pipeline_mode<synchronous>, transform_indices = @transform_2, window_bounds = array<i64: 4, 32, 8>}, {pipeline_mode = #tpu.pipeline_mode<synchronous>, transform_indices = @transform_3, window_bounds = array<i64: 4, 32, 8>}, {pipeline_mode = #tpu.pipeline_mode<synchronous>, transform_indices = @transform_4, window_bounds = array<i64: 4, 1, 8>}, {pipeline_mode = #tpu.pipeline_mode<synchronous>, transform_indices = @transform_5, window_bounds = array<i64: 4, 1, 8>}, {pipeline_mode = #tpu.pipeline_mode<synchronous>, transform_indices = @transform_6, window_bounds = array<i64: 4, 1, 8>}, {transform_indices = @transform_7, window_bounds = array<i64: 1, 4, 8, 8>}, {transform_indices = @transform_8, window_bounds = array<i64: 1, 4, 8, 8>}, {transform_indices = @transform_9, window_bounds = array<i64: 1, 4, 8, 8>}]} {
    %c0 = arith.constant 0 : index
    %c0_0 = arith.constant 0 : index
    %c0_1 = arith.constant 0 : index
    %0 = vector.load %arg2[%c0, %c0_0, %c0_1] : memref<1x8x32xf32, #tpu.memory_space<vmem>>, vector<1x8x32xf32>
    %1 = vector.shape_cast %0 : vector<1x8x32xf32> to vector<8x32xf32>
    %c0_2 = arith.constant 0 : index
    %c0_3 = arith.constant 0 : index
    %c0_4 = arith.constant 0 : index
    %2 = vector.load %arg3[%c0_2, %c0_3, %c0_4] : memref<4x32x8xf32, #tpu.memory_space<vmem>>, vector<1x32x8xf32>
    %3 = vector.shape_cast %2 : vector<1x32x8xf32> to vector<32x8xf32>
    %cst = arith.constant dense<0.000000e+00> : vector<8x8xf32>
    %4 = tpu.matmul %1, %3, %cst {dimension_numbers = #tpu.dot_dimension_numbers<[1], [0], [0], [1], [0, 0, 1, 1], [], []>} : vector<8x32xf32>, vector<32x8xf32>, vector<8x8xf32> -> vector<8x8xf32>
    %c0_5 = arith.constant 0 : index
    %c0_6 = arith.constant 0 : index
    %c0_7 = arith.constant 0 : index
    %5 = vector.load %arg6[%c0_5, %c0_6, %c0_7] : memref<4x1x8xf32, #tpu.memory_space<vmem>>, vector<1x1x8xf32>
    %6 = vector.shape_cast %5 : vector<1x1x8xf32> to vector<1x8xf32>
    %7 = vector.broadcast %6 : vector<1x8xf32> to vector<8x8xf32>
    %8 = arith.addf %4, %7 : vector<8x8xf32>
    %c0_8 = arith.constant 0 : index
    %c0_9 = arith.constant 0 : index
    %c0_10 = arith.constant 0 : index
    %9 = vector.load %arg4[%c0_8, %c0_9, %c0_10] : memref<4x32x8xf32, #tpu.memory_space<vmem>>, vector<1x32x8xf32>
    %10 = vector.shape_cast %9 : vector<1x32x8xf32> to vector<32x8xf32>
    %cst_11 = arith.constant dense<0.000000e+00> : vector<8x8xf32>
    %11 = tpu.matmul %1, %10, %cst_11 {dimension_numbers = #tpu.dot_dimension_numbers<[1], [0], [0], [1], [0, 0, 1, 1], [], []>} : vector<8x32xf32>, vector<32x8xf32>, vector<8x8xf32> -> vector<8x8xf32>
    %c0_12 = arith.constant 0 : index
    %c0_13 = arith.constant 0 : index
    %c0_14 = arith.constant 0 : index
    %12 = vector.load %arg7[%c0_12, %c0_13, %c0_14] : memref<4x1x8xf32, #tpu.memory_space<vmem>>, vector<1x1x8xf32>
    %13 = vector.shape_cast %12 : vector<1x1x8xf32> to vector<1x8xf32>
    %14 = vector.broadcast %13 : vector<1x8xf32> to vector<8x8xf32>
    %15 = arith.addf %11, %14 : vector<8x8xf32>
    %c0_15 = arith.constant 0 : index
    %c0_16 = arith.constant 0 : index
    %c0_17 = arith.constant 0 : index
    %16 = vector.load %arg5[%c0_15, %c0_16, %c0_17] : memref<4x32x8xf32, #tpu.memory_space<vmem>>, vector<1x32x8xf32>
    %17 = vector.shape_cast %16 : vector<1x32x8xf32> to vector<32x8xf32>
    %cst_18 = arith.constant dense<0.000000e+00> : vector<8x8xf32>
    %18 = tpu.matmul %1, %17, %cst_18 {dimension_numbers = #tpu.dot_dimension_numbers<[1], [0], [0], [1], [0, 0, 1, 1], [], []>} : vector<8x32xf32>, vector<32x8xf32>, vector<8x8xf32> -> vector<8x8xf32>
    %c0_19 = arith.constant 0 : index
    %c0_20 = arith.constant 0 : index
    %c0_21 = arith.constant 0 : index
    %19 = vector.load %arg8[%c0_19, %c0_20, %c0_21] : memref<4x1x8xf32, #tpu.memory_space<vmem>>, vector<1x1x8xf32>
    %20 = vector.shape_cast %19 : vector<1x1x8xf32> to vector<1x8xf32>
    %21 = vector.broadcast %20 : vector<1x8xf32> to vector<8x8xf32>
    %22 = arith.addf %18, %21 : vector<8x8xf32>
    %c0_22 = arith.constant 0 : index
    %c0_23 = arith.constant 0 : index
    %c0_24 = arith.constant 0 : index
    %c0_25 = arith.constant 0 : index
    %23 = vector.load %arg9[%c0_22, %c0_23, %c0_24, %c0_25] : memref<1x4x8x8xf32, #tpu.memory_space<vmem>>, vector<1x1x8x8xf32>
    %24 = vector.shape_cast %23 : vector<1x1x8x8xf32> to vector<8x8xf32>
    %25 = vector.shape_cast %8 : vector<8x8xf32> to vector<1x1x8x8xf32>
    tpu.vector_store %arg9[%c0_22, %c0_23, %c0_24, %c0_25], %25 {strides = array<i32>} : memref<1x4x8x8xf32, #tpu.memory_space<vmem>>, vector<1x1x8x8xf32>,
    %c0_26 = arith.constant 0 : index
    %c0_27 = arith.constant 0 : index
    %c0_28 = arith.constant 0 : index
    %c0_29 = arith.constant 0 : index
    %26 = vector.load %arg10[%c0_26, %c0_27, %c0_28, %c0_29] : memref<1x4x8x8xf32, #tpu.memory_space<vmem>>, vector<1x1x8x8xf32>
    %27 = vector.shape_cast %26 : vector<1x1x8x8xf32> to vector<8x8xf32>
    %28 = vector.shape_cast %15 : vector<8x8xf32> to vector<1x1x8x8xf32>
    tpu.vector_store %arg10[%c0_26, %c0_27, %c0_28, %c0_29], %28 {strides = array<i32>} : memref<1x4x8x8xf32, #tpu.memory_space<vmem>>, vector<1x1x8x8xf32>,
    %c0_30 = arith.constant 0 : index
    %c0_31 = arith.constant 0 : index
    %c0_32 = arith.constant 0 : index
    %c0_33 = arith.constant 0 : index
    %29 = vector.load %arg11[%c0_30, %c0_31, %c0_32, %c0_33] : memref<1x4x8x8xf32, #tpu.memory_space<vmem>>, vector<1x1x8x8xf32>
    %30 = vector.shape_cast %29 : vector<1x1x8x8xf32> to vector<8x8xf32>
    %31 = vector.shape_cast %22 : vector<8x8xf32> to vector<1x1x8x8xf32>
    tpu.vector_store %arg11[%c0_30, %c0_31, %c0_32, %c0_33], %31 {strides = array<i32>} : memref<1x4x8x8xf32, #tpu.memory_space<vmem>>, vector<1x1x8x8xf32>,
    %c1 = arith.constant 1 : index
    %c0_34 = arith.constant 0 : index
    %c0_35 = arith.constant 0 : index
    %32 = vector.load %arg3[%c1, %c0_34, %c0_35] : memref<4x32x8xf32, #tpu.memory_space<vmem>>, vector<1x32x8xf32>
    %33 = vector.shape_cast %32 : vector<1x32x8xf32> to vector<32x8xf32>
    %cst_36 = arith.constant dense<0.000000e+00> : vector<8x8xf32>
    %34 = tpu.matmul %1, %33, %cst_36 {dimension_numbers = #tpu.dot_dimension_numbers<[1], [0], [0], [1], [0, 0, 1, 1], [], []>} : vector<8x32xf32>, vector<32x8xf32>, vector<8x8xf32> -> vector<8x8xf32>
    %c1_37 = arith.constant 1 : index
    %c0_38 = arith.constant 0 : index
    %c0_39 = arith.constant 0 : index
    %35 = vector.load %arg6[%c1_37, %c0_38, %c0_39] : memref<4x1x8xf32, #tpu.memory_space<vmem>>, vector<1x1x8xf32>
    %36 = vector.shape_cast %35 : vector<1x1x8xf32> to vector<1x8xf32>
    %37 = vector.broadcast %36 : vector<1x8xf32> to vector<8x8xf32>
    %38 = arith.addf %34, %37 : vector<8x8xf32>
    %c1_40 = arith.constant 1 : index
    %c0_41 = arith.constant 0 : index
    %c0_42 = arith.constant 0 : index
    %39 = vector.load %arg4[%c1_40, %c0_41, %c0_42] : memref<4x32x8xf32, #tpu.memory_space<vmem>>, vector<1x32x8xf32>
    %40 = vector.shape_cast %39 : vector<1x32x8xf32> to vector<32x8xf32>
    %cst_43 = arith.constant dense<0.000000e+00> : vector<8x8xf32>
    %41 = tpu.matmul %1, %40, %cst_43 {dimension_numbers = #tpu.dot_dimension_numbers<[1], [0], [0], [1], [0, 0, 1, 1], [], []>} : vector<8x32xf32>, vector<32x8xf32>, vector<8x8xf32> -> vector<8x8xf32>
    %c1_44 = arith.constant 1 : index
    %c0_45 = arith.constant 0 : index
    %c0_46 = arith.constant 0 : index
    %42 = vector.load %arg7[%c1_44, %c0_45, %c0_46] : memref<4x1x8xf32, #tpu.memory_space<vmem>>, vector<1x1x8xf32>
    %43 = vector.shape_cast %42 : vector<1x1x8xf32> to vector<1x8xf32>
    %44 = vector.broadcast %43 : vector<1x8xf32> to vector<8x8xf32>
    %45 = arith.addf %41, %44 : vector<8x8xf32>
    %c1_47 = arith.constant 1 : index
    %c0_48 = arith.constant 0 : index
    %c0_49 = arith.constant 0 : index
    %46 = vector.load %arg5[%c1_47, %c0_48, %c0_49] : memref<4x32x8xf32, #tpu.memory_space<vmem>>, vector<1x32x8xf32>
    %47 = vector.shape_cast %46 : vector<1x32x8xf32> to vector<32x8xf32>
    %cst_50 = arith.constant dense<0.000000e+00> : vector<8x8xf32>
    %48 = tpu.matmul %1, %47, %cst_50 {dimension_numbers = #tpu.dot_dimension_numbers<[1], [0], [0], [1], [0, 0, 1, 1], [], []>} : vector<8x32xf32>, vector<32x8xf32>, vector<8x8xf32> -> vector<8x8xf32>
    %c1_51 = arith.constant 1 : index
    %c0_52 = arith.constant 0 : index
    %c0_53 = arith.constant 0 : index
    %49 = vector.load %arg8[%c1_51, %c0_52, %c0_53] : memref<4x1x8xf32, #tpu.memory_space<vmem>>, vector<1x1x8xf32>
    %50 = vector.shape_cast %49 : vector<1x1x8xf32> to vector<1x8xf32>
    %51 = vector.broadcast %50 : vector<1x8xf32> to vector<8x8xf32>
    %52 = arith.addf %48, %51 : vector<8x8xf32>
    %c0_54 = arith.constant 0 : index
    %c1_55 = arith.constant 1 : index
    %c0_56 = arith.constant 0 : index
    %c0_57 = arith.constant 0 : index
    %53 = vector.load %arg9[%c0_54, %c1_55, %c0_56, %c0_57] : memref<1x4x8x8xf32, #tpu.memory_space<vmem>>, vector<1x1x8x8xf32>
    %54 = vector.shape_cast %53 : vector<1x1x8x8xf32> to vector<8x8xf32>
    %55 = vector.shape_cast %38 : vector<8x8xf32> to vector<1x1x8x8xf32>
    tpu.vector_store %arg9[%c0_54, %c1_55, %c0_56, %c0_57], %55 {strides = array<i32>} : memref<1x4x8x8xf32, #tpu.memory_space<vmem>>, vector<1x1x8x8xf32>,
    %c0_58 = arith.constant 0 : index
    %c1_59 = arith.constant 1 : index
    %c0_60 = arith.constant 0 : index
    %c0_61 = arith.constant 0 : index
    %56 = vector.load %arg10[%c0_58, %c1_59, %c0_60, %c0_61] : memref<1x4x8x8xf32, #tpu.memory_space<vmem>>, vector<1x1x8x8xf32>
    %57 = vector.shape_cast %56 : vector<1x1x8x8xf32> to vector<8x8xf32>
    %58 = vector.shape_cast %45 : vector<8x8xf32> to vector<1x1x8x8xf32>
    tpu.vector_store %arg10[%c0_58, %c1_59, %c0_60, %c0_61], %58 {strides = array<i32>} : memref<1x4x8x8xf32, #tpu.memory_space<vmem>>, vector<1x1x8x8xf32>,
    %c0_62 = arith.constant 0 : index
    %c1_63 = arith.constant 1 : index
    %c0_64 = arith.constant 0 : index
    %c0_65 = arith.constant 0 : index
    %59 = vector.load %arg11[%c0_62, %c1_63, %c0_64, %c0_65] : memref<1x4x8x8xf32, #tpu.memory_space<vmem>>, vector<1x1x8x8xf32>
    %60 = vector.shape_cast %59 : vector<1x1x8x8xf32> to vector<8x8xf32>
    %61 = vector.shape_cast %52 : vector<8x8xf32> to vector<1x1x8x8xf32>
    tpu.vector_store %arg11[%c0_62, %c1_63, %c0_64, %c0_65], %61 {strides = array<i32>} : memref<1x4x8x8xf32, #tpu.memory_space<vmem>>, vector<1x1x8x8xf32>,
    %c2 = arith.constant 2 : index
    %c0_66 = arith.constant 0 : index
    %c0_67 = arith.constant 0 : index
    %62 = vector.load %arg3[%c2, %c0_66, %c0_67] : memref<4x32x8xf32, #tpu.memory_space<vmem>>, vector<1x32x8xf32>
    %63 = vector.shape_cast %62 : vector<1x32x8xf32> to vector<32x8xf32>
    %cst_68 = arith.constant dense<0.000000e+00> : vector<8x8xf32>
    %64 = tpu.matmul %1, %63, %cst_68 {dimension_numbers = #tpu.dot_dimension_numbers<[1], [0], [0], [1], [0, 0, 1, 1], [], []>} : vector<8x32xf32>, vector<32x8xf32>, vector<8x8xf32> -> vector<8x8xf32>
    %c2_69 = arith.constant 2 : index
    %c0_70 = arith.constant 0 : index
    %c0_71 = arith.constant 0 : index
    %65 = vector.load %arg6[%c2_69, %c0_70, %c0_71] : memref<4x1x8xf32, #tpu.memory_space<vmem>>, vector<1x1x8xf32>
    %66 = vector.shape_cast %65 : vector<1x1x8xf32> to vector<1x8xf32>
    %67 = vector.broadcast %66 : vector<1x8xf32> to vector<8x8xf32>
    %68 = arith.addf %64, %67 : vector<8x8xf32>
    %c2_72 = arith.constant 2 : index
    %c0_73 = arith.constant 0 : index
    %c0_74 = arith.constant 0 : index
    %69 = vector.load %arg4[%c2_72, %c0_73, %c0_74] : memref<4x32x8xf32, #tpu.memory_space<vmem>>, vector<1x32x8xf32>
    %70 = vector.shape_cast %69 : vector<1x32x8xf32> to vector<32x8xf32>
    %cst_75 = arith.constant dense<0.000000e+00> : vector<8x8xf32>
    %71 = tpu.matmul %1, %70, %cst_75 {dimension_numbers = #tpu.dot_dimension_numbers<[1], [0], [0], [1], [0, 0, 1, 1], [], []>} : vector<8x32xf32>, vector<32x8xf32>, vector<8x8xf32> -> vector<8x8xf32>
    %c2_76 = arith.constant 2 : index
    %c0_77 = arith.constant 0 : index
    %c0_78 = arith.constant 0 : index
    %72 = vector.load %arg7[%c2_76, %c0_77, %c0_78] : memref<4x1x8xf32, #tpu.memory_space<vmem>>, vector<1x1x8xf32>
    %73 = vector.shape_cast %72 : vector<1x1x8xf32> to vector<1x8xf32>
    %74 = vector.broadcast %73 : vector<1x8xf32> to vector<8x8xf32>
    %75 = arith.addf %71, %74 : vector<8x8xf32>
    %c2_79 = arith.constant 2 : index
    %c0_80 = arith.constant 0 : index
    %c0_81 = arith.constant 0 : index
    %76 = vector.load %arg5[%c2_79, %c0_80, %c0_81] : memref<4x32x8xf32, #tpu.memory_space<vmem>>, vector<1x32x8xf32>
    %77 = vector.shape_cast %76 : vector<1x32x8xf32> to vector<32x8xf32>
    %cst_82 = arith.constant dense<0.000000e+00> : vector<8x8xf32>
    %78 = tpu.matmul %1, %77, %cst_82 {dimension_numbers = #tpu.dot_dimension_numbers<[1], [0], [0], [1], [0, 0, 1, 1], [], []>} : vector<8x32xf32>, vector<32x8xf32>, vector<8x8xf32> -> vector<8x8xf32>
    %c2_83 = arith.constant 2 : index
    %c0_84 = arith.constant 0 : index
    %c0_85 = arith.constant 0 : index
    %79 = vector.load %arg8[%c2_83, %c0_84, %c0_85] : memref<4x1x8xf32, #tpu.memory_space<vmem>>, vector<1x1x8xf32>
    %80 = vector.shape_cast %79 : vector<1x1x8xf32> to vector<1x8xf32>
    %81 = vector.broadcast %80 : vector<1x8xf32> to vector<8x8xf32>
    %82 = arith.addf %78, %81 : vector<8x8xf32>
    %c0_86 = arith.constant 0 : index
    %c2_87 = arith.constant 2 : index
    %c0_88 = arith.constant 0 : index
    %c0_89 = arith.constant 0 : index
    %83 = vector.load %arg9[%c0_86, %c2_87, %c0_88, %c0_89] : memref<1x4x8x8xf32, #tpu.memory_space<vmem>>, vector<1x1x8x8xf32>
    %84 = vector.shape_cast %83 : vector<1x1x8x8xf32> to vector<8x8xf32>
    %85 = vector.shape_cast %68 : vector<8x8xf32> to vector<1x1x8x8xf32>
    tpu.vector_store %arg9[%c0_86, %c2_87, %c0_88, %c0_89], %85 {strides = array<i32>} : memref<1x4x8x8xf32, #tpu.memory_space<vmem>>, vector<1x1x8x8xf32>,
    %c0_90 = arith.constant 0 : index
    %c2_91 = arith.constant 2 : index
    %c0_92 = arith.constant 0 : index
    %c0_93 = arith.constant 0 : index
    %86 = vector.load %arg10[%c0_90, %c2_91, %c0_92, %c0_93] : memref<1x4x8x8xf32, #tpu.memory_space<vmem>>, vector<1x1x8x8xf32>
    %87 = vector.shape_cast %86 : vector<1x1x8x8xf32> to vector<8x8xf32>
    %88 = vector.shape_cast %75 : vector<8x8xf32> to vector<1x1x8x8xf32>
    tpu.vector_store %arg10[%c0_90, %c2_91, %c0_92, %c0_93], %88 {strides = array<i32>} : memref<1x4x8x8xf32, #tpu.memory_space<vmem>>, vector<1x1x8x8xf32>,
    %c0_94 = arith.constant 0 : index
    %c2_95 = arith.constant 2 : index
    %c0_96 = arith.constant 0 : index
    %c0_97 = arith.constant 0 : index
    %89 = vector.load %arg11[%c0_94, %c2_95, %c0_96, %c0_97] : memref<1x4x8x8xf32, #tpu.memory_space<vmem>>, vector<1x1x8x8xf32>
    %90 = vector.shape_cast %89 : vector<1x1x8x8xf32> to vector<8x8xf32>
    %91 = vector.shape_cast %82 : vector<8x8xf32> to vector<1x1x8x8xf32>
    tpu.vector_store %arg11[%c0_94, %c2_95, %c0_96, %c0_97], %91 {strides = array<i32>} : memref<1x4x8x8xf32, #tpu.memory_space<vmem>>, vector<1x1x8x8xf32>,
    %c3 = arith.constant 3 : index
    %c0_98 = arith.constant 0 : index
    %c0_99 = arith.constant 0 : index
    %92 = vector.load %arg3[%c3, %c0_98, %c0_99] : memref<4x32x8xf32, #tpu.memory_space<vmem>>, vector<1x32x8xf32>
    %93 = vector.shape_cast %92 : vector<1x32x8xf32> to vector<32x8xf32>
    %cst_100 = arith.constant dense<0.000000e+00> : vector<8x8xf32>
    %94 = tpu.matmul %1, %93, %cst_100 {dimension_numbers = #tpu.dot_dimension_numbers<[1], [0], [0], [1], [0, 0, 1, 1], [], []>} : vector<8x32xf32>, vector<32x8xf32>, vector<8x8xf32> -> vector<8x8xf32>
    %c3_101 = arith.constant 3 : index
    %c0_102 = arith.constant 0 : index
    %c0_103 = arith.constant 0 : index
    %95 = vector.load %arg6[%c3_101, %c0_102, %c0_103] : memref<4x1x8xf32, #tpu.memory_space<vmem>>, vector<1x1x8xf32>
    %96 = vector.shape_cast %95 : vector<1x1x8xf32> to vector<1x8xf32>
    %97 = vector.broadcast %96 : vector<1x8xf32> to vector<8x8xf32>
    %98 = arith.addf %94, %97 : vector<8x8xf32>
    %c3_104 = arith.constant 3 : index
    %c0_105 = arith.constant 0 : index
    %c0_106 = arith.constant 0 : index
    %99 = vector.load %arg4[%c3_104, %c0_105, %c0_106] : memref<4x32x8xf32, #tpu.memory_space<vmem>>, vector<1x32x8xf32>
    %100 = vector.shape_cast %99 : vector<1x32x8xf32> to vector<32x8xf32>
    %cst_107 = arith.constant dense<0.000000e+00> : vector<8x8xf32>
    %101 = tpu.matmul %1, %100, %cst_107 {dimension_numbers = #tpu.dot_dimension_numbers<[1], [0], [0], [1], [0, 0, 1, 1], [], []>} : vector<8x32xf32>, vector<32x8xf32>, vector<8x8xf32> -> vector<8x8xf32>
    %c3_108 = arith.constant 3 : index
    %c0_109 = arith.constant 0 : index
    %c0_110 = arith.constant 0 : index
    %102 = vector.load %arg7[%c3_108, %c0_109, %c0_110] : memref<4x1x8xf32, #tpu.memory_space<vmem>>, vector<1x1x8xf32>
    %103 = vector.shape_cast %102 : vector<1x1x8xf32> to vector<1x8xf32>
    %104 = vector.broadcast %103 : vector<1x8xf32> to vector<8x8xf32>
    %105 = arith.addf %101, %104 : vector<8x8xf32>
    %c3_111 = arith.constant 3 : index
    %c0_112 = arith.constant 0 : index
    %c0_113 = arith.constant 0 : index
    %106 = vector.load %arg5[%c3_111, %c0_112, %c0_113] : memref<4x32x8xf32, #tpu.memory_space<vmem>>, vector<1x32x8xf32>
    %107 = vector.shape_cast %106 : vector<1x32x8xf32> to vector<32x8xf32>
    %cst_114 = arith.constant dense<0.000000e+00> : vector<8x8xf32>
    %108 = tpu.matmul %1, %107, %cst_114 {dimension_numbers = #tpu.dot_dimension_numbers<[1], [0], [0], [1], [0, 0, 1, 1], [], []>} : vector<8x32xf32>, vector<32x8xf32>, vector<8x8xf32> -> vector<8x8xf32>
    %c3_115 = arith.constant 3 : index
    %c0_116 = arith.constant 0 : index
    %c0_117 = arith.constant 0 : index
    %109 = vector.load %arg8[%c3_115, %c0_116, %c0_117] : memref<4x1x8xf32, #tpu.memory_space<vmem>>, vector<1x1x8xf32>
    %110 = vector.shape_cast %109 : vector<1x1x8xf32> to vector<1x8xf32>
    %111 = vector.broadcast %110 : vector<1x8xf32> to vector<8x8xf32>
    %112 = arith.addf %108, %111 : vector<8x8xf32>
    %c0_118 = arith.constant 0 : index
    %c3_119 = arith.constant 3 : index
    %c0_120 = arith.constant 0 : index
    %c0_121 = arith.constant 0 : index
    %113 = vector.load %arg9[%c0_118, %c3_119, %c0_120, %c0_121] : memref<1x4x8x8xf32, #tpu.memory_space<vmem>>, vector<1x1x8x8xf32>
    %114 = vector.shape_cast %113 : vector<1x1x8x8xf32> to vector<8x8xf32>
    %115 = vector.shape_cast %98 : vector<8x8xf32> to vector<1x1x8x8xf32>
    tpu.vector_store %arg9[%c0_118, %c3_119, %c0_120, %c0_121], %115 {strides = array<i32>} : memref<1x4x8x8xf32, #tpu.memory_space<vmem>>, vector<1x1x8x8xf32>,
    %c0_122 = arith.constant 0 : index
    %c3_123 = arith.constant 3 : index
    %c0_124 = arith.constant 0 : index
    %c0_125 = arith.constant 0 : index
    %116 = vector.load %arg10[%c0_122, %c3_123, %c0_124, %c0_125] : memref<1x4x8x8xf32, #tpu.memory_space<vmem>>, vector<1x1x8x8xf32>
    %117 = vector.shape_cast %116 : vector<1x1x8x8xf32> to vector<8x8xf32>
    %118 = vector.shape_cast %105 : vector<8x8xf32> to vector<1x1x8x8xf32>
    tpu.vector_store %arg10[%c0_122, %c3_123, %c0_124, %c0_125], %118 {strides = array<i32>} : memref<1x4x8x8xf32, #tpu.memory_space<vmem>>, vector<1x1x8x8xf32>,
    %c0_126 = arith.constant 0 : index
    %c3_127 = arith.constant 3 : index
    %c0_128 = arith.constant 0 : index
    %c0_129 = arith.constant 0 : index
    %119 = vector.load %arg11[%c0_126, %c3_127, %c0_128, %c0_129] : memref<1x4x8x8xf32, #tpu.memory_space<vmem>>, vector<1x1x8x8xf32>
    %120 = vector.shape_cast %119 : vector<1x1x8x8xf32> to vector<8x8xf32>
    %121 = vector.shape_cast %112 : vector<8x8xf32> to vector<1x1x8x8xf32>
    tpu.vector_store %arg11[%c0_126, %c3_127, %c0_128, %c0_129], %121 {strides = array<i32>} : memref<1x4x8x8xf32, #tpu.memory_space<vmem>>, vector<1x1x8x8xf32>,
    return
  }
  func.func @transform_0(%arg0: i32, %arg1: i32) -> (i32, i32, i32) {
    %c0_i32 = arith.constant 0 : i32
    %c0_i32_0 = arith.constant 0 : i32
    return %arg0, %arg1, %c0_i32 : i32, i32, i32
  }
  func.func @transform_1(%arg0: i32, %arg1: i32) -> (i32, i32, i32) {
    %c0_i32 = arith.constant 0 : i32
    %c0_i32_0 = arith.constant 0 : i32
    %c0_i32_1 = arith.constant 0 : i32
    %c0_i32_2 = arith.constant 0 : i32
    return %c0_i32, %c0_i32_0, %c0_i32_1 : i32, i32, i32
  }
  func.func @transform_2(%arg0: i32, %arg1: i32) -> (i32, i32, i32) {
    %c0_i32 = arith.constant 0 : i32
    %c0_i32_0 = arith.constant 0 : i32
    %c0_i32_1 = arith.constant 0 : i32
    %c0_i32_2 = arith.constant 0 : i32
    return %c0_i32, %c0_i32_0, %c0_i32_1 : i32, i32, i32
  }
  func.func @transform_3(%arg0: i32, %arg1: i32) -> (i32, i32, i32) {
    %c0_i32 = arith.constant 0 : i32
    %c0_i32_0 = arith.constant 0 : i32
    %c0_i32_1 = arith.constant 0 : i32
    %c0_i32_2 = arith.constant 0 : i32
    return %c0_i32, %c0_i32_0, %c0_i32_1 : i32, i32, i32
  }
  func.func @transform_4(%arg0: i32, %arg1: i32) -> (i32, i32, i32) {
    %c0_i32 = arith.constant 0 : i32
    %c0_i32_0 = arith.constant 0 : i32
    %c0_i32_1 = arith.constant 0 : i32
    %c0_i32_2 = arith.constant 0 : i32
    return %c0_i32, %c0_i32_0, %c0_i32_1 : i32, i32, i32
  }
  func.func @transform_5(%arg0: i32, %arg1: i32) -> (i32, i32, i32) {
    %c0_i32 = arith.constant 0 : i32
    %c0_i32_0 = arith.constant 0 : i32
    %c0_i32_1 = arith.constant 0 : i32
    %c0_i32_2 = arith.constant 0 : i32
    return %c0_i32, %c0_i32_0, %c0_i32_1 : i32, i32, i32
  }
  func.func @transform_6(%arg0: i32, %arg1: i32) -> (i32, i32, i32) {
    %c0_i32 = arith.constant 0 : i32
    %c0_i32_0 = arith.constant 0 : i32
    %c0_i32_1 = arith.constant 0 : i32
    %c0_i32_2 = arith.constant 0 : i32
    return %c0_i32, %c0_i32_0, %c0_i32_1 : i32, i32, i32
  }
  func.func @transform_7(%arg0: i32, %arg1: i32) -> (i32, i32, i32, i32) {
    %c0_i32 = arith.constant 0 : i32
    %c0_i32_0 = arith.constant 0 : i32
    %c0_i32_1 = arith.constant 0 : i32
    return %arg0, %c0_i32, %arg1, %c0_i32_0 : i32, i32, i32, i32
  }
  func.func @transform_8(%arg0: i32, %arg1: i32) -> (i32, i32, i32, i32) {
    %c0_i32 = arith.constant 0 : i32
    %c0_i32_0 = arith.constant 0 : i32
    %c0_i32_1 = arith.constant 0 : i32
    return %arg0, %c0_i32, %arg1, %c0_i32_0 : i32, i32, i32, i32
  }
  func.func @transform_9(%arg0: i32, %arg1: i32) -> (i32, i32, i32, i32) {
    %c0_i32 = arith.constant 0 : i32
    %c0_i32_0 = arith.constant 0 : i32
    %c0_i32_1 = arith.constant 0 : i32
    return %arg0, %c0_i32, %arg1, %c0_i32_0 : i32, i32, i32, i32
  }
}

</mosaic_0001>

<bundles_post_ra>
// kernel: tpu_custom_call.1
= control target key start
LH: loop header
LB: loop body
LE: loop exit
PB: predicated region body
PF: predicated region fallthrough
CT: control target
= control target key end

     0   :  { %s2141_s30 = smov 0   ;;  %s2143_s10 = smov 0   ;;  %s2570_s0 = inlined_call_operand.vmem [shape: f32[2,16,32], index: 0, kind: input, shape index: {}]   ;;  %s2571_s1 = inlined_call_operand.vmem [shape: f32[4,32,8], index: 1, kind: input, shape index: {}]   ;;  %s2572_s2 = inlined_call_operand.vmem [shape: f32[4,32,8], index: 2, kind: input, shape index: {}]   ;;  %s2573_s3 = inlined_call_operand.vmem [shape: f32[4,32,8], index: 3, kind: input, shape index: {}]   ;;  %s2574_s4 = inlined_call_operand.vmem [shape: f32[4,1,8], index: 4, kind: input, shape index: {}]   ;;  %s2575_s5 = inlined_call_operand.vmem [shape: f32[4,1,8], index: 5, kind: input, shape index: {}]   ;;  %s2576_s6 = inlined_call_operand.vmem [shape: f32[4,1,8], index: 6, kind: input, shape index: {}]   ;;  %s2577_s7 = inlined_call_operand.vmem [shape: f32[2,4,16,8], index: 7, kind: output, shape index: {0}]   ;;  %s2578_s8 = inlined_call_operand.vmem [shape: f32[2,4,16,8], index: 8, kind: output, shape index: {1}]   ;;  %s2579_s9 = inlined_call_operand.vmem [shape: f32[2,4,16,8], index: 9, kind: output, shape index: {2}]  }
   0x1   :  { %s2145_s11 = smov 0   ;;  %s2147_s12 = smov 0  }
   0x2   :  { %s2149_s13 = smov 0   ;;  %s2151_s14 = smov 0  }
   0x3   :  { %s2153_s15 = smov 0  }
   0x4 LB: > { %s29_s16 = sadd.s32 1, %s2079_s13  ;;  %s32_s17 = sadd.s32 1, %s2083_s14  ;;  %s2087_s15 = sphi %s2153_s15, %s20_s15   ;;  %s2083_s14 = sphi %s2151_s14, %s2589_s14   ;;  %s2079_s13 = sphi %s2149_s13, %s2588_s13   ;;  %s2075_s12 = sphi %s2147_s12, %s2587_s12   ;;  %s2071_s11 = sphi %s2145_s11, %s2586_s11   ;;  %s2067_s10 = sphi %s2143_s10, %s2585_s10   ;;  %s2063_s30 = sphi %s2141_s30, %s2584_s30  }
   0x5   : > { %p30_p0 = scmp.ge.s32.totalorder %s29_s16, 2  ;;  %s1684_s18 = sadd.s32 4294967295, %s2087_s15  }
   0x6   : > { %p205_p1 = scmp.ne.s32.totalorder %s2067_s10, %s2063_s30  ;;  %p206_p2 = scmp.eq.s32.totalorder %s1684_s18, 3 }
   0x7   : > { %s2591_s16 = smov (%p30_p0, %s29_s16), 0  ;;  %s2593_s17 = smov (!%p30_p0, %s32_s17), %s2083_s14 }
   0x8   : > { %s191_s19 = ssub.s32 %s2079_s13, %s2591_s16  ;;  %p34_p3 = scmp.ge.s32.totalorder %s2593_s17, 2 }
   0x9   : > { %p1688_p4 = scmp.ge.s32.totalorder %s2087_s15, 1  ;;  %p2187_p5 = por %p206_p2, %p205_p1 }
   0xa   : > { %p315_p6 = scmp.lt.s32.totalorder %s2087_s15, 5  ;;  %s2595_s17 = smov (%p34_p3, %s2593_s17), 0 }
   0xb   : > { %2582 = sst [smem:[#allocation5_spill]] %s2595_s17  ;;  %s190_s21 = ssub.s32 %s2083_s14, %s2595_s17 }
   0xc   : > { %p316_p7 = pnand %p1688_p4, %p315_p6  ;;  %s192_s22 = sor.u32 %s191_s19, %s190_s21 }
   0xd   : > { %s195_s23 = sadd.s32 1, %s2067_s10  ;;  %p193_p8 = scmp.eq.s32.totalorder %s192_s22, 0 }
   0xe   : > { %319 = sbr.rel (%p316_p7) target bundleno = 289 (0x121), region = 48  ;;  %p361_p9 = scmp.lt.s32.totalorder (!%p316_p7), %s2075_s12, 1 }
   0xf   : > { %s2198_s24 = scalar_select %p193_p8, %s2067_s10, %s195_s23  }
  0x10   : > { %p363_p10 = scmp.lt.s32.totalorder (!%p316_p7), %s2071_s11, 1  ;;  %s346_s19 = sand.u32 (!%p316_p7), 1, %s2063_s30  }
  0x13   : > { %v373_v0 = vld [vmem:[%s2571_s1 + $0x18] sm:$0xff]  ;;  %v2089_v2 = vmov 0.0   ;;  %v372_v3 = vld [vmem:[%s2571_s1 + $0x10] sm:$0xff]  ;;  %s362_s22 = scalar_select %p361_p9, %s2075_s12, 1  ;;  %v371_v5 = vld [vmem:[%s2571_s1 + $0x8] sm:$0xff]  ;;  %vm381_vm0 = vcmask 261120  }
  0x14   : > { %v458_v1 = vld [vmem:[%s2572_s2 + $0x18] sm:$0xff]  ;;  %1843 = vmatprep.subr.mxu0 %v2089_v2  ;;  %1854 = vmatprep.subr.mxu1 %v2089_v2  ;;  %v457_v4 = vld [vmem:[%s2572_s2 + $0x10] sm:$0xff]  ;;  %v456_v6 = vld [vmem:[%s2572_s2 + $0x8] sm:$0xff]  ;;  %s364_s28 = scalar_select %p363_p10, %s2071_s11, 1  ;;  %vm2090_vm1 = vmmov 0   ;;  %vm617_vm2 = vcmask 64512  }
  0x15   : > { %1844 = vmatpush3.msra.mxu0 %v373_v0  ;;  %1855 = vmatpush3.msra.mxu1 %v458_v1  ;;  %s1692_s29 = sshll.u32 %s362_s22, 1  ;;  %v370_v7 = vld [vmem:[%s2571_s1] sm:$0xff]  ;;  %v539_v10 = vld [vmem:[%s2573_s3 + $0x18] sm:$0xff]  ;;  %v538_v12 = vld [vmem:[%s2573_s3 + $0x10] sm:$0xff] }
  0x16   : > { %1845 = vmatprep.subr.mxu0 %v2089_v2  ;;  %1856 = vmatprep.subr.mxu1 %v2089_v2  ;;  %s366_s21 = sadd.s32 %s1692_s29, %s364_s28  ;;  %v455_v8 = vld [vmem:[%s2572_s2] sm:$0xff]  ;;  %v1703_v11 = vld [vmem:[%s2571_s1 + $0x38] sm:$0xff]  ;;  %v1702_v13 = vld [vmem:[%s2571_s1 + $0x30] sm:$0xff]  ;;  %s1775_s29 = sshll.u32 (%p2187_p5), %s2075_s12, 3 }
  0x17   : > { %1846 = vmatpush3.msra.mxu0 %v372_v3  ;;  %1857 = vmatpush3.msra.mxu1 %v457_v4  ;;  %s1693_s26 = sshll.u32 %s366_s21, 3  ;;  %v537_v14 = vld [vmem:[%s2573_s3 + $0x8] sm:$0xff]  ;;  %v536_v16 = vld [vmem:[%s2573_s3] sm:$0xff]  ;;  %v1710_v18 = vld [vmem:[%s2572_s2 + $0x38] sm:$0xff]  ;;  %s1402_s18 = sadd.s32 (%p2187_p5), %s2071_s11, %s1775_s29 }
  0x18   : > { %1847 = vmatprep.subr.mxu0 %v2089_v2  ;;  %1858 = vmatprep.subr.mxu1 %v2089_v2  ;;  %s368_s17 = scalar_lea.vmem %s2570_s0, %s1693_s26  ;;  %v1701_v15 = vld [vmem:[%s2571_s1 + $0x28] sm:$0xff]  ;;  %v1700_v17 = vld [vmem:[%s2571_s1 + $0x20] sm:$0xff]  ;;  %v1717_v19 = vld [vmem:[%s2573_s3 + $0x38] sm:$0xff]  ;;  %s1776_s21 = sshll.u32 (%p2187_p5), %s1402_s18, 3 }
  0x19   : > { %1848 = vmatpush3.msra.mxu0 %v371_v5  ;;  %1859 = vmatpush3.msra.mxu1 %v456_v6  ;;  %v2241_v9 = vld [vmem:[%s368_s17] sm:$0xff]  ;;  %v1709_v20 = vld [vmem:[%s2572_s2 + $0x30] sm:$0xff]  ;;  %v1708_v22 = vld [vmem:[%s2572_s2 + $0x28] sm:$0xff]  ;;  %s1689_s17 = sshll.u32 %s346_s19, 5  ;;  %s1404_s26 = scalar_lea.vmem (%p2187_p5), %s2577_s7, %s1776_s21 }
  0x1a   : > { %1849 = vmatprep.subr.mxu0 %v2089_v2  ;;  %1860 = vmatprep.subr.mxu1 %v2089_v2  ;;  %v1716_v21 = vld [vmem:[%s2573_s3 + $0x30] sm:$0xff]  ;;  %v1715_v23 = vld [vmem:[%s2573_s3 + $0x28] sm:$0xff]  ;;  %v1707_v24 = vld [vmem:[%s2572_s2 + $0x20] sm:$0xff]  ;;  %s2456_s22 = scalar_lea.vmem [#allocation2], %s1689_s17  ;;  %s2460_s30 = scalar_lea.vmem [#allocation3], %s1689_s17 }
  0x1b   : > { %1850 = vmatpush3.msra.mxu0 %v370_v7  ;;  %1851 = vmatprep.mubr.msk.f32.mxu0 %vm2090_vm1, %v2089_v2  ;;  %v1714_v25 = vld [vmem:[%s2573_s3 + $0x20] sm:$0xff]  ;;  %v1727_v26 = vld [vmem:[%s2571_s1 + $0x58] sm:$0xff]  ;;  %v1726_v28 = vld [vmem:[%s2571_s1 + $0x50] sm:$0xff]  ;;  %s2470_s19 = scalar_lea.vmem [#allocation4], %s1689_s17 }
  0x1c   : > { %1861 = vmatpush3.msra.mxu1 %v455_v8  ;;  %1862 = vmatprep.mubr.msk.f32.mxu1 %vm2090_vm1, %v2089_v2  ;;  %v1734_v27 = vld [vmem:[%s2572_s2 + $0x58] sm:$0xff]  ;;  %v1733_v29 = vld [vmem:[%s2572_s2 + $0x50] sm:$0xff]  ;;  %v1725_v30 = vld [vmem:[%s2571_s1 + $0x48] sm:$0xff] }
  0x1d   : > { %1852 = vmatmul.mubr.msk.f32.vlgmr.msra.gmra.mxu0 %vm381_vm0, %v2241_v9  ;;  %1863 = vmatmul.mubr.msk.f32.vlgmr.msra.gmra.mxu1 %vm381_vm0, %v2241_v9  ;;  %v1732_v31 = vld [vmem:[%s2572_s2 + $0x48] sm:$0xff]  ;;  %v1724_v32 = vld [vmem:[%s2571_s1 + $0x40] sm:$0xff]  ;;  %v1741_v34 = vld [vmem:[%s2573_s3 + $0x58] sm:$0xff] }
  0x1e   : > { %1865 = vmatprep.subr.mxu0 %v2089_v2  ;;  %1876 = vmatprep.subr.mxu1 %v2089_v2  ;;  %v1731_v33 = vld [vmem:[%s2572_s2 + $0x40] sm:$0xff]  ;;  %v1751_v35 = vld [vmem:[%s2571_s1 + $0x78] sm:$0xff]  ;;  %v1740_v36 = vld [vmem:[%s2573_s3 + $0x50] sm:$0xff] }
  0x1f   : > { %1866 = vmatpush3.msra.mxu0 %v539_v10  ;;  %1877 = vmatpush3.msra.mxu1 %v1703_v11  ;;  %v1750_v37 = vld [vmem:[%s2571_s1 + $0x70] sm:$0xff]  ;;  %v1739_v38 = vld [vmem:[%s2573_s3 + $0x48] sm:$0xff]  ;;  %v1738_v40 = vld [vmem:[%s2573_s3 + $0x40] sm:$0xff] }
  0x20   : > { %1867 = vmatprep.subr.mxu0 %v2089_v2  ;;  %1878 = vmatprep.subr.mxu1 %v2089_v2  ;;  %v1749_v39 = vld [vmem:[%s2571_s1 + $0x68] sm:$0xff]  ;;  %v1748_v41 = vld [vmem:[%s2571_s1 + $0x60] sm:$0xff]  ;;  %v1758_v42 = vld [vmem:[%s2572_s2 + $0x78] sm:$0xff] }
  0x21   : > { %1868 = vmatpush3.msra.mxu0 %v538_v12  ;;  %1879 = vmatpush3.msra.mxu1 %v1702_v13  ;;  %v1765_v43 = vld [vmem:[%s2573_s3 + $0x78] sm:$0xff]  ;;  %v1757_v44 = vld [vmem:[%s2572_s2 + $0x70] sm:$0xff]  ;;  %v1756_v46 = vld [vmem:[%s2572_s2 + $0x68] sm:$0xff] }
  0x22   : > { %1869 = vmatprep.subr.mxu0 %v2089_v2  ;;  %1880 = vmatprep.subr.mxu1 %v2089_v2  ;;  %v1764_v45 = vld [vmem:[%s2573_s3 + $0x70] sm:$0xff]  ;;  %v1763_v47 = vld [vmem:[%s2573_s3 + $0x68] sm:$0xff]  ;;  %v1755_v48 = vld [vmem:[%s2572_s2 + $0x60] sm:$0xff] }
  0x23   : > { %1870 = vmatpush3.msra.mxu0 %v537_v14  ;;  %1881 = vmatpush3.msra.mxu1 %v1701_v15  ;;  %v1762_v49 = vld [vmem:[%s2573_s3 + $0x60] sm:$0xff] }
  0x24   : > { %1871 = vmatprep.subr.mxu0 %v2089_v2  ;;  %1882 = vmatprep.subr.mxu1 %v2089_v2  ;;  %v1694_v50 = vld [vmem:[%s2574_s4] ss:$0 sm:$0xff]  ;;  %v1705_v59 = vld [vmem:[%s2574_s4 + $0x1] ss:$0 sm:$0xff]  ;;  %v1729_v10 = vld [vmem:[%s2574_s4 + $0x2] ss:$0 sm:$0xff] }
  0x25   : > { %1872 = vmatpush3.msra.mxu0 %v536_v16  ;;  %1873 = vmatprep.mubr.msk.f32.mxu0 %vm2090_vm1, %v2089_v2  ;;  %v1696_v51 = vld [vmem:[%s2575_s5] ss:$0 sm:$0xff]  ;;  %v1719_v3 = vld [vmem:[%s2576_s6 + $0x1] ss:$0 sm:$0xff]  ;;  %v1736_v11 = vld [vmem:[%s2575_s5 + $0x2] ss:$0 sm:$0xff] }
  0x26   : > { %1883 = vmatpush3.msra.mxu1 %v1700_v17  ;;  %1884 = vmatprep.mubr.msk.f32.mxu1 %vm2090_vm1, %v2089_v2  ;;  %v1698_v58 = vld [vmem:[%s2576_s6] ss:$0 sm:$0xff] }
  0x27   : > { %1874 = vmatmul.mubr.msk.f32.vlgmr.msra.gmra.mxu0 %vm381_vm0, %v2241_v9  ;;  %1885 = vmatmul.mubr.msk.f32.vlgmr.msra.gmra.mxu1 %vm381_vm0, %v2241_v9 }
  0x28   : > { %1887 = vmatprep.subr.mxu0 %v2089_v2  ;;  %1898 = vmatprep.subr.mxu1 %v2089_v2 }
  0x29   : > { %1888 = vmatpush3.msra.mxu0 %v1710_v18  ;;  %1899 = vmatpush3.msra.mxu1 %v1717_v19  ;;  %v1743_v18 = vld [vmem:[%s2576_s6 + $0x2] ss:$0 sm:$0xff]  ;;  %v1753_v19 = vld [vmem:[%s2574_s4 + $0x3] ss:$0 sm:$0xff] }
  0x2a   : > { %1889 = vmatprep.subr.mxu0 %v2089_v2  ;;  %1900 = vmatprep.subr.mxu1 %v2089_v2 }
  0x2b   : > { %1890 = vmatpush3.msra.mxu0 %v1709_v20  ;;  %1901 = vmatpush3.msra.mxu1 %v1716_v21 }
  0x2c   : > { %1891 = vmatprep.subr.mxu0 %v2089_v2  ;;  %1902 = vmatprep.subr.mxu1 %v2089_v2 }
  0x2d   : > { %1892 = vmatpush3.msra.mxu0 %v1708_v22  ;;  %1903 = vmatpush3.msra.mxu1 %v1715_v23 }
  0x2e   : > { %1893 = vmatprep.subr.mxu0 %v2089_v2  ;;  %1904 = vmatprep.subr.mxu1 %v2089_v2 }
  0x2f   : > { %1894 = vmatpush3.msra.mxu0 %v1707_v24  ;;  %1895 = vmatprep.mubr.msk.f32.mxu0 %vm2090_vm1, %v2089_v2 }
  0x30   : > { %1905 = vmatpush3.msra.mxu1 %v1714_v25  ;;  %1906 = vmatprep.mubr.msk.f32.mxu1 %vm2090_vm1, %v2089_v2 }
  0x31   : > { %1896 = vmatmul.mubr.msk.f32.vlgmr.msra.gmra.mxu0 %vm381_vm0, %v2241_v9  ;;  %1907 = vmatmul.mubr.msk.f32.vlgmr.msra.gmra.mxu1 %vm381_vm0, %v2241_v9 }
  0x32   : > { %1909 = vmatprep.subr.mxu0 %v2089_v2  ;;  %1920 = vmatprep.subr.mxu1 %v2089_v2 }
  0x33   : > { %1910 = vmatpush3.msra.mxu0 %v1727_v26  ;;  %1921 = vmatpush3.msra.mxu1 %v1734_v27  ;;  %v1760_v26 = vld [vmem:[%s2575_s5 + $0x3] ss:$0 sm:$0xff] }
  0x34   : > { %1911 = vmatprep.subr.mxu0 %v2089_v2  ;;  %1922 = vmatprep.subr.mxu1 %v2089_v2  ;;  %v1767_v27 = vld [vmem:[%s2576_s6 + $0x3] ss:$0 sm:$0xff] }
  0x35   : > { %1912 = vmatpush3.msra.mxu0 %v1726_v28  ;;  %1923 = vmatpush3.msra.mxu1 %v1733_v29 }
  0x36   : > { %1913 = vmatprep.subr.mxu0 %v2089_v2  ;;  %1924 = vmatprep.subr.mxu1 %v2089_v2 }
  0x37   : > { %1914 = vmatpush3.msra.mxu0 %v1725_v30  ;;  %1925 = vmatpush3.msra.mxu1 %v1732_v31 }
  0x38   : > { %1915 = vmatprep.subr.mxu0 %v2089_v2  ;;  %1926 = vmatprep.subr.mxu1 %v2089_v2 }
  0x39   : > { %1916 = vmatpush3.msra.mxu0 %v1724_v32  ;;  %1917 = vmatprep.mubr.msk.f32.mxu0 %vm2090_vm1, %v2089_v2 }
  0x3a   : > { %1927 = vmatpush3.msra.mxu1 %v1731_v33  ;;  %1928 = vmatprep.mubr.msk.f32.mxu1 %vm2090_vm1, %v2089_v2 }
  0x3b   : > { %1918 = vmatmul.mubr.msk.f32.vlgmr.msra.gmra.mxu0 %vm381_vm0, %v2241_v9  ;;  %1929 = vmatmul.mubr.msk.f32.vlgmr.msra.gmra.mxu1 %vm381_vm0, %v2241_v9 }
  0x3c   : > { %1931 = vmatprep.subr.mxu0 %v2089_v2  ;;  %1942 = vmatprep.subr.mxu1 %v2089_v2 }
  0x3d   : > { %1932 = vmatpush3.msra.mxu0 %v1741_v34  ;;  %1943 = vmatpush3.msra.mxu1 %v1751_v35 }
  0x3e   : > { %1933 = vmatprep.subr.mxu0 %v2089_v2  ;;  %1944 = vmatprep.subr.mxu1 %v2089_v2 }
  0x3f   : > { %1934 = vmatpush3.msra.mxu0 %v1740_v36  ;;  %1945 = vmatpush3.msra.mxu1 %v1750_v37 }
  0x40   : > { %1935 = vmatprep.subr.mxu0 %v2089_v2  ;;  %1946 = vmatprep.subr.mxu1 %v2089_v2 }
  0x41   : > { %1936 = vmatpush3.msra.mxu0 %v1739_v38  ;;  %1947 = vmatpush3.msra.mxu1 %v1749_v39 }
  0x42   : > { %1937 = vmatprep.subr.mxu0 %v2089_v2  ;;  %1948 = vmatprep.subr.mxu1 %v2089_v2 }
  0x43   : > { %1938 = vmatpush3.msra.mxu0 %v1738_v40  ;;  %1939 = vmatprep.mubr.msk.f32.mxu0 %vm2090_vm1, %v2089_v2 }
  0x44   : > { %1949 = vmatpush3.msra.mxu1 %v1748_v41  ;;  %1950 = vmatprep.mubr.msk.f32.mxu1 %vm2090_vm1, %v2089_v2 }
  0x45   : > { %1940 = vmatmul.mubr.msk.f32.vlgmr.msra.gmra.mxu0 %vm381_vm0, %v2241_v9  ;;  %1951 = vmatmul.mubr.msk.f32.vlgmr.msra.gmra.mxu1 %vm381_vm0, %v2241_v9 }
  0x46   : > { %1953 = vmatprep.subr.mxu0 %v2089_v2  ;;  %1964 = vmatprep.subr.mxu1 %v2089_v2 }
  0x47   : > { %1954 = vmatpush3.msra.mxu0 %v1758_v42  ;;  %1965 = vmatpush3.msra.mxu1 %v1765_v43 }
  0x48   : > { %1955 = vmatprep.subr.mxu0 %v2089_v2  ;;  %1966 = vmatprep.subr.mxu1 %v2089_v2 }
  0x49   : > { %1956 = vmatpush3.msra.mxu0 %v1757_v44  ;;  %1967 = vmatpush3.msra.mxu1 %v1764_v45 }
  0x4a   : > { %1957 = vmatprep.subr.mxu0 %v2089_v2  ;;  %1968 = vmatprep.subr.mxu1 %v2089_v2 }
  0x4b   : > { %1958 = vmatpush3.msra.mxu0 %v1756_v46  ;;  %1969 = vmatpush3.msra.mxu1 %v1763_v47 }
  0x4c   : > { %1959 = vmatprep.subr.mxu0 %v2089_v2  ;;  %1970 = vmatprep.subr.mxu1 %v2089_v2 }
  0x4d   : > { %1960 = vmatpush3.msra.mxu0 %v1755_v48  ;;  %1961 = vmatprep.mubr.msk.f32.mxu0 %vm2090_vm1, %v2089_v2 }
  0x4e   : > { %1971 = vmatpush3.msra.mxu1 %v1762_v49  ;;  %1972 = vmatprep.mubr.msk.f32.mxu1 %vm2090_vm1, %v2089_v2  ;;  %v1712_v2 = vld [vmem:[%s2575_s5 + $0x1] ss:$0 sm:$0xff] }
  0x4f   : > { %1962 = vmatmul.mubr.msk.f32.vlgmr.msra.gmra.mxu0 %vm381_vm0, %v2241_v9  ;;  %1973 = vmatmul.mubr.msk.f32.vlgmr.msra.gmra.mxu1 %vm381_vm0, %v2241_v9 }
  0xdd   : > { %v451_v52 = vpop.f32.mrf.mxu0  ;;  %v532_v53 = vpop.f32.mrf.mxu1 }
  0xde   : > { %v452_v54 = vadd.f32 %v1694_v50, %v451_v52  ;;  %v533_v55 = vadd.f32 %v1696_v51, %v532_v53 }
  0xdf   : > { %v1853_v56 = vpop.f32.mrf.mxu0  ;;  %v1864_v57 = vpop.f32.mrf.mxu1 }
  0xe0   : > { %618 = vst.msk [vmem:[%s2456_s22] sm:$0xff] %vm617_vm2, %v452_v54  ;;  %619 = vst.msk [vmem:[%s2460_s30] sm:$0xff] %vm617_vm2, %v533_v55 }
  0xe7   : > { %v613_v60 = vpop.f32.mrf.mxu0  ;;  %v700_v61 = vpop.f32.mrf.mxu1  ;;  %v1439_v34 = vld [vmem:[%s2456_s22] sm:$0xff] (%p2187_p5) }
  0xe8   : > { %v614_v62 = vadd.f32 %v1698_v58, %v613_v60  ;;  %v701_v63 = vadd.f32 %v1705_v59, %v700_v61  ;;  %1440 = vst [vmem:[%s1404_s26] sm:$0xff] (%p2187_p5), %v1439_v34 }
  0xe9   : > { %v1875_v0 = vpop.f32.mrf.mxu0  ;;  %v1886_v1 = vpop.f32.mrf.mxu1 }
  0xea   : > { %620 = vst.msk [vmem:[%s2470_s19] sm:$0xff] %vm617_vm2, %v614_v62  ;;  %1721 = vst.msk [vmem:[%s2456_s22 + $0x8] sm:$0xff] %vm617_vm2, %v701_v63 }
  0xf1   : > { %v783_v4 = vpop.f32.mrf.mxu0  ;;  %v866_v5 = vpop.f32.mrf.mxu1  ;;  %v1441_v35 = vld [vmem:[%s2456_s22 + $0x8] sm:$0xff] (%p2187_p5) }
  0xf2   : > { %v784_v6 = vadd.f32 %v1712_v2, %v783_v4  ;;  %v867_v7 = vadd.f32 %v1719_v3, %v866_v5  ;;  %1442 = vst [vmem:[%s1404_s26 + $0x10] sm:$0xff] (%p2187_p5), %v1441_v35 }
  0xf3   : > { %v1897_v8 = vpop.f32.mrf.mxu0  ;;  %v1908_v9 = vpop.f32.mrf.mxu1 }
  0xf4   : > { %1722 = vst.msk [vmem:[%s2460_s30 + $0x8] sm:$0xff] %vm617_vm2, %v784_v6  ;;  %1723 = vst.msk [vmem:[%s2470_s19 + $0x8] sm:$0xff] %vm617_vm2, %v867_v7 }
  0xfb   : > { %v955_v12 = vpop.f32.mrf.mxu0  ;;  %v1038_v13 = vpop.f32.mrf.mxu1 }
  0xfc   : > { %v956_v14 = vadd.f32 %v1729_v10, %v955_v12  ;;  %v1039_v15 = vadd.f32 %v1736_v11, %v1038_v13 }
  0xfd   : > { %v1919_v16 = vpop.f32.mrf.mxu0  ;;  %v1930_v17 = vpop.f32.mrf.mxu1 }
  0xfe   : > { %1745 = vst.msk [vmem:[%s2456_s22 + $0x10] sm:$0xff] %vm617_vm2, %v956_v14  ;;  %1746 = vst.msk [vmem:[%s2460_s30 + $0x10] sm:$0xff] %vm617_vm2, %v1039_v15 }
 0x105   : > { %v1121_v20 = vpop.f32.mrf.mxu0  ;;  %v1210_v21 = vpop.f32.mrf.mxu1  ;;  %v1443_v36 = vld [vmem:[%s2456_s22 + $0x10] sm:$0xff] (%p2187_p5) }
 0x106   : > { %v1122_v22 = vadd.f32 %v1743_v18, %v1121_v20  ;;  %v1211_v23 = vadd.f32 %v1753_v19, %v1210_v21  ;;  %1444 = vst [vmem:[%s1404_s26 + $0x20] sm:$0xff] (%p2187_p5), %v1443_v36 }
 0x107   : > { %v1941_v24 = vpop.f32.mrf.mxu0  ;;  %v1952_v25 = vpop.f32.mrf.mxu1 }
 0x108   : > { %1747 = vst.msk [vmem:[%s2470_s19 + $0x10] sm:$0xff] %vm617_vm2, %v1122_v22  ;;  %1769 = vst.msk [vmem:[%s2456_s22 + $0x18] sm:$0xff] %vm617_vm2, %v1211_v23 }
 0x10e   : > { %1400 = sbr.rel (!%p2187_p5) target bundleno = 275 (0x113), region = 52 }
 0x10f   : > { %v1293_v28 = vpop.f32.mrf.mxu0  ;;  %v1376_v29 = vpop.f32.mrf.mxu1  ;;  %v1445_v37 = vld [vmem:[%s2456_s22 + $0x18] sm:$0xff] (%p2187_p5) }
 0x110   : > { %v1294_v30 = vadd.f32 %v1760_v26, %v1293_v28  ;;  %v1377_v31 = vadd.f32 %v1767_v27, %v1376_v29  ;;  %1446 = vst [vmem:[%s1404_s26 + $0x30] sm:$0xff] (%p2187_p5), %v1445_v37 }
 0x111   : > { %v1963_v32 = vpop.f32.mrf.mxu0  ;;  %v1974_v33 = vpop.f32.mrf.mxu1 }
 0x112   : > { %1770 = vst.msk [vmem:[%s2460_s30 + $0x18] sm:$0xff] %vm617_vm2, %v1294_v30  ;;  %1771 = vst.msk [vmem:[%s2470_s19 + $0x18] sm:$0xff] %vm617_vm2, %v1377_v31 }
 0x113 PF: > { %1452 = sbr.rel (!%p2187_p5) target bundleno = 283 (0x11b), region = 90  ;;  %s1777_s22 = sshll.u32 (%p2187_p5), %s2075_s12, 3  ;;  %v1491_v38 = vld [vmem:[%s2460_s30] sm:$0xff] (%p2187_p5)  ;;  %v1493_v39 = vld [vmem:[%s2460_s30 + $0x8] sm:$0xff] (%p2187_p5)  ;;  %v1495_v40 = vld [vmem:[%s2460_s30 + $0x10] sm:$0xff] (%p2187_p5) }
 0x114   : > { %s1454_s17 = sadd.s32 (%p2187_p5), %s2071_s11, %s1777_s22 }
 0x115   : > { %s1778_s27 = sshll.u32 (%p2187_p5), %s1454_s17, 3 }
 0x116   : > { %s1456_s18 = scalar_lea.vmem (%p2187_p5), %s2578_s8, %s1778_s27 }
 0x117   : > { %1492 = vst [vmem:[%s1456_s18] sm:$0xff] (%p2187_p5), %v1491_v38  ;;  %1494 = vst [vmem:[%s1456_s18 + $0x10] sm:$0xff] (%p2187_p5), %v1493_v39 }
 0x118   : > { %1496 = vst [vmem:[%s1456_s18 + $0x20] sm:$0xff] %v1495_v40 }
 0x119   : > { %v1497_v41 = vld [vmem:[%s2460_s30 + $0x18] sm:$0xff] }
 0x11a   : > { %1498 = vst [vmem:[%s1456_s18 + $0x30] sm:$0xff] %v1497_v41 }
 0x11b PF: > { %1504 = sbr.rel (!%p2187_p5) target bundleno = 289 (0x121), region = 128  ;;  %s1779_s30 = sshll.u32 (%p2187_p5), %s2075_s12, 3  ;;  %v1543_v42 = vld [vmem:[%s2470_s19] sm:$0xff] (%p2187_p5)  ;;  %v1545_v43 = vld [vmem:[%s2470_s19 + $0x8] sm:$0xff] (%p2187_p5)  ;;  %v1547_v44 = vld [vmem:[%s2470_s19 + $0x10] sm:$0xff] (%p2187_p5) }
 0x11c   : > { %s1506_s21 = sadd.s32 (%p2187_p5), %s2071_s11, %s1779_s30  ;;  %v1549_v45 = vld [vmem:[%s2470_s19 + $0x18] sm:$0xff] (%p2187_p5) }
 0x11d   : > { %s1780_s23 = sshll.u32 (%p2187_p5), %s1506_s21, 3 }
 0x11e   : > { %s1508_s22 = scalar_lea.vmem (%p2187_p5), %s2579_s9, %s1780_s23 }
 0x11f   : > { %1544 = vst [vmem:[%s1508_s22] sm:$0xff] (%p2187_p5), %v1543_v42  ;;  %1546 = vst [vmem:[%s1508_s22 + $0x10] sm:$0xff] (%p2187_p5), %v1545_v43 }
 0x120   : > { %1548 = vst [vmem:[%s1508_s22 + $0x20] sm:$0xff] %v1547_v44  ;;  %1550 = vst [vmem:[%s1508_s22 + $0x30] sm:$0xff] %v1549_v45 }
 0x121 PF: > { %s20_s15 = sadd.s32 1, %s2087_s15   ;;  %s2583_s20 = sld [smem:[#allocation5_spill]] }
 0x122   : > { %p17_p11 = scmp.ge.s32.totalorder %s20_s15, 6   ;;  %s2584_s30 = smov %s2067_s10 }
 0x123   : > { %s2585_s10 = smov %s2198_s24  ;;  %s2586_s11 = smov %s2079_s13 }
 0x124   : > { %s2587_s12 = smov %s2083_s14  ;;  %s2588_s13 = smov %s2591_s16 }
 0x125   :  { %19 = sbr.rel (!%p17_p11) target bundleno = 4 (0x4), region = 243 }
 0x127   : > { %s2589_s14 = smov %s2583_s20 }

</bundles_post_ra>
